<compile_context>
chip_gen: v7x
topology: tpu7x:2x2x1
jax: 0.10.0
libtpu: 0.0.40
codegen_flags: <defaults>
</compile_context>

<pallas_src>
import functools

import jax
import jax.numpy as jnp
from jax.experimental import pallas as pl
from jax.experimental.pallas import tpu as pltpu

NUM_CLASSES = 30
IN_FEATURES = 6
HIDDEN = 256
K_PAD = 8  # pad the K=6 contraction to a full sublane group


def mlp_kernel(x_ref, w1_ref, b1_ref, w2_ref, b2_ref, o_ref):
    # One grid step handles TM rows of the batch:
    #   h   = relu(x @ W1 + b1)        bf16 MXU matmul, f32 accumulate, f32 VPU math
    #   out = sigmoid(h @ W2 + b2)     bf16 MXU matmul, f32 accumulate, EUP exp/rcp
    x = x_ref[...]                                                     # (TM, 8) bf16
    h = jnp.dot(x, w1_ref[...], preferred_element_type=jnp.float32)   # (TM, 256) f32
    h = jnp.maximum(h + b1_ref[...], 0.0)                             # bias + ReLU in f32
    y = jnp.dot(h.astype(jnp.bfloat16), w2_ref[...],
                preferred_element_type=jnp.float32)                   # (TM, 30) f32
    y = y + b2_ref[...]
    # sigmoid(y) = 1 / (1 + exp(-y)); approx reciprocal runs on the EUP slot.
    o_ref[...] = pl.reciprocal(1.0 + jnp.exp(-y), approx=True).astype(o_ref.dtype)


def _round_up(n, m):
    return ((n + m - 1) // m) * m


def prepare_params(w1, b1, w2, b2):
    """One-time pad/cast of the weights (hoisted out of the per-call path).

    w1: (6, 256), b1: (256,)|(1,256), w2: (256, 30), b2: (30,)|(1,30).
    Weights are (in, out) so the kernel computes x @ W directly.
    """
    w1_p = jnp.zeros((K_PAD, HIDDEN), jnp.bfloat16)
    w1_p = w1_p.at[:IN_FEATURES, :].set(jnp.asarray(w1, jnp.float32).astype(jnp.bfloat16))
    b1_p = jnp.asarray(b1, jnp.float32).reshape(1, HIDDEN)
    w2_p = jnp.asarray(w2, jnp.float32).astype(jnp.bfloat16).reshape(HIDDEN, NUM_CLASSES)
    b2_p = jnp.asarray(b2, jnp.float32).reshape(1, NUM_CLASSES)
    return w1_p, b1_p, w2_p, b2_p


@functools.partial(jax.jit, static_argnames=("tm_max",))
def net_forward(x, params, *, tm_max=2048):
    """x: (B, 6) f32; params = prepare_params(...).  Returns (B, 30) bf16 sigmoid probs."""
    w1_p, b1_p, w2_p, b2_p = params
    B = x.shape[0]

    # Tile selection: balance tiles so last-tile padding is <= one 16-row group,
    # round TM to the bf16-native 16-row sublane tile, cap at tm_max.
    n_tiles = max(1, pl.cdiv(B, tm_max))
    if B >= 1024 and n_tiles < 2:
        n_tiles = 2  # keep both TensorCores busy on v7x megacore
    TM = _round_up(pl.cdiv(B, n_tiles), 16)
    B_pad = TM * n_tiles

    # Per-call work: pad/cast only x (weights are pre-padded).
    x_p = jnp.zeros((B_pad, K_PAD), jnp.bfloat16)
    x_p = x_p.at[:B, :IN_FEATURES].set(x.astype(jnp.bfloat16))

    flops = 2 * B_pad * (K_PAD * HIDDEN + HIDDEN * NUM_CLASSES)
    bytes_accessed = (x_p.size * 2 + w1_p.size * 2 + b1_p.size * 4
                      + w2_p.size * 2 + b2_p.size * 4 + B_pad * NUM_CLASSES * 2)

    out = pl.pallas_call(
        mlp_kernel,
        out_shape=jax.ShapeDtypeStruct((B_pad, NUM_CLASSES), jnp.bfloat16),
        grid=(n_tiles,),
        in_specs=[
            pl.BlockSpec((TM, K_PAD), lambda i: (i, 0)),             # x: streamed per tile
            pl.BlockSpec((K_PAD, HIDDEN), lambda i: (0, 0)),         # W1: VMEM-resident
            pl.BlockSpec((1, HIDDEN), lambda i: (0, 0)),             # b1: VMEM-resident
            pl.BlockSpec((HIDDEN, NUM_CLASSES), lambda i: (0, 0)),   # W2: VMEM-resident
            pl.BlockSpec((1, NUM_CLASSES), lambda i: (0, 0)),        # b2: VMEM-resident
        ],
        out_specs=pl.BlockSpec((TM, NUM_CLASSES), lambda i: (i, 0)),
        compiler_params=pltpu.CompilerParams(
            dimension_semantics=("parallel",),   # megacore sharding on v7x
            vmem_limit_bytes=32 << 20,           # safe on v5e/v6e/v7x; headroom for TM=4096
        ),
        cost_estimate=pl.CostEstimate(
            flops=flops,
            transcendentals=B_pad * NUM_CLASSES,
            bytes_accessed=bytes_accessed,
        ),
    )(x_p, w1_p, b1_p, w2_p, b2_p)

    # Only a batch-dim slice remains; cast to f32 in the caller if needed.
    return out[:B]


def init_params(key):
    """Deterministic init mimicking nn.Linear's U(-1/sqrt(fan_in), 1/sqrt(fan_in))."""
    k1, k2, k3, k4 = jax.random.split(key, 4)
    bound1 = 1.0 / jnp.sqrt(IN_FEATURES)
    bound2 = 1.0 / jnp.sqrt(HIDDEN)
    w1 = jax.random.uniform(k1, (IN_FEATURES, HIDDEN), jnp.float32, -bound1, bound1)
    b1 = jax.random.uniform(k2, (1, HIDDEN), jnp.float32, -bound1, bound1)
    w2 = jax.random.uniform(k3, (HIDDEN, NUM_CLASSES), jnp.float32, -bound2, bound2)
    b2 = jax.random.uniform(k4, (1, NUM_CLASSES), jnp.float32, -bound2, bound2)
    return w1, b1, w2, b2


def _reference(x, w1, b1, w2, b2):
    # Plain-JAX f32 reference with the exact PyTorch forward semantics.
    return jax.nn.sigmoid(jnp.maximum(x @ w1 + b1, 0.0) @ w2 + b2)


if __name__ == "__main__":
    key = jax.random.PRNGKey(0)
    kx, kx2, kp = jax.random.split(key, 3)
    w1, b1, w2, b2 = init_params(kp)
    params = prepare_params(w1, b1, w2, b2)   # one-time weight pad/cast

    # bf16 MXU operands + bf16 output: compare to f32 reference at 2e-2 tolerance.
    tol = dict(atol=2e-2, rtol=2e-2)

    # Small-batch check (matches the module's typical use); single grid step.
    batch = 8
    x = jax.random.normal(kx, (batch, IN_FEATURES), dtype=jnp.float32)
    out = jax.block_until_ready(net_forward(x, params))
    assert out.shape == (batch, NUM_CLASSES)
    assert jnp.allclose(out.astype(jnp.float32), _reference(x, w1, b1, w2, b2), **tol)

    # Non-multiple-of-tile batch with a small tm_max to exercise the multi-step grid,
    # balanced-TM selection, and resident weights across grid iterations.
    batch2 = 600
    x2 = jax.random.normal(kx2, (batch2, IN_FEATURES), dtype=jnp.float32)
    out2 = jax.block_until_ready(net_forward(x2, params, tm_max=256))
    assert out2.shape == (batch2, NUM_CLASSES)
    assert jnp.allclose(out2.astype(jnp.float32), _reference(x2, w1, b1, w2, b2), **tol)

    # Same batch through the default (single-tile, TM balanced to 608) path.
    out3 = jax.block_until_ready(net_forward(x2, params))
    assert out3.shape == (batch2, NUM_CLASSES)
    assert jnp.allclose(out3.astype(jnp.float32), _reference(x2, w1, b1, w2, b2), **tol)

    print("KERNEL_OK")
</pallas_src>

<mosaic_0001>
module attributes {stable_mosaic.version = 11 : i64} {
  func.func @mlp_kernel(%arg0: i32, %arg1: memref<16x8xbf16, #tpu.memory_space<vmem>>, %arg2: memref<8x256xbf16, #tpu.memory_space<vmem>>, %arg3: memref<1x256xf32, #tpu.memory_space<vmem>>, %arg4: memref<256x30xbf16, #tpu.memory_space<vmem>>, %arg5: memref<1x30xf32, #tpu.memory_space<vmem>>, %arg6: memref<16x30xbf16, #tpu.memory_space<vmem>>) attributes {dimension_semantics = [#tpu.dimension_semantics<parallel>], iteration_bounds = array<i64: 1>, scalar_prefetch = 0 : i64, scratch_operands = 0 : i64, tpu.core_type = #tpu.core_type<tc>, window_params = [{transform_indices = @transform_0, window_bounds = array<i64: 16, 8>}, {pipeline_mode = #tpu.pipeline_mode<synchronous>, transform_indices = @transform_1, window_bounds = array<i64: 8, 256>}, {pipeline_mode = #tpu.pipeline_mode<synchronous>, transform_indices = @transform_2, window_bounds = array<i64: 1, 256>}, {pipeline_mode = #tpu.pipeline_mode<synchronous>, transform_indices = @transform_3, window_bounds = array<i64: 256, 30>}, {pipeline_mode = #tpu.pipeline_mode<synchronous>, transform_indices = @transform_4, window_bounds = array<i64: 1, 30>}, {transform_indices = @transform_5, window_bounds = array<i64: 16, 30>}]} {
    %c0 = arith.constant 0 : index
    %c0_0 = arith.constant 0 : index
    %0 = vector.load %arg1[%c0, %c0_0] : memref<16x8xbf16, #tpu.memory_space<vmem>>, vector<16x8xbf16>
    %c0_1 = arith.constant 0 : index
    %c0_2 = arith.constant 0 : index
    %1 = vector.load %arg2[%c0_1, %c0_2] : memref<8x256xbf16, #tpu.memory_space<vmem>>, vector<8x256xbf16>
    %cst = arith.constant dense<0.000000e+00> : vector<16x256xf32>
    %2 = tpu.matmul %0, %1, %cst {dimension_numbers = #tpu.dot_dimension_numbers<[1], [0], [0], [1], [0, 0, 1, 1], [], []>} : vector<16x8xbf16>, vector<8x256xbf16>, vector<16x256xf32> -> vector<16x256xf32>
    %c0_3 = arith.constant 0 : index
    %c0_4 = arith.constant 0 : index
    %3 = vector.load %arg3[%c0_3, %c0_4] : memref<1x256xf32, #tpu.memory_space<vmem>>, vector<1x256xf32>
    %4 = vector.broadcast %3 : vector<1x256xf32> to vector<16x256xf32>
    %5 = arith.addf %2, %4 : vector<16x256xf32>
    %cst_5 = arith.constant 0.000000e+00 : f32
    %6 = vector.broadcast %cst_5 : f32 to vector<16x256xf32>
    %7 = arith.maximumf %5, %6 : vector<16x256xf32>
    %8 = arith.truncf %7 : vector<16x256xf32> to vector<16x256xbf16>
    %c0_6 = arith.constant 0 : index
    %c0_7 = arith.constant 0 : index
    %9 = vector.load %arg4[%c0_6, %c0_7] : memref<256x30xbf16, #tpu.memory_space<vmem>>, vector<256x30xbf16>
    %cst_8 = arith.constant dense<0.000000e+00> : vector<16x30xf32>
    %10 = tpu.matmul %8, %9, %cst_8 {dimension_numbers = #tpu.dot_dimension_numbers<[1], [0], [0], [1], [0, 0, 1, 1], [], []>} : vector<16x256xbf16>, vector<256x30xbf16>, vector<16x30xf32> -> vector<16x30xf32>
    %c0_9 = arith.constant 0 : index
    %c0_10 = arith.constant 0 : index
    %11 = vector.load %arg5[%c0_9, %c0_10] : memref<1x30xf32, #tpu.memory_space<vmem>>, vector<1x30xf32>
    %12 = vector.broadcast %11 : vector<1x30xf32> to vector<16x30xf32>
    %13 = arith.addf %10, %12 : vector<16x30xf32>
    %cst_11 = arith.constant 0.000000e+00 : f32
    %14 = vector.broadcast %cst_11 : f32 to vector<16x30xf32>
    %15 = arith.subf %14, %13 : vector<16x30xf32>
    %16 = math.exp %15 : vector<16x30xf32>
    %cst_12 = arith.constant 1.000000e+00 : f32
    %17 = vector.broadcast %cst_12 : f32 to vector<16x30xf32>
    %18 = arith.addf %17, %16 : vector<16x30xf32>
    %19 = tpu.reciprocal %18 {approx = true} : vector<16x30xf32> -> vector<16x30xf32>
    %20 = arith.truncf %19 : vector<16x30xf32> to vector<16x30xbf16>
    %c0_13 = arith.constant 0 : index
    %c0_14 = arith.constant 0 : index
    %21 = vector.load %arg6[%c0_13, %c0_14] : memref<16x30xbf16, #tpu.memory_space<vmem>>, vector<16x30xbf16>
    tpu.vector_store %arg6[%c0_13, %c0_14], %20 {strides = array<i32>} : memref<16x30xbf16, #tpu.memory_space<vmem>>, vector<16x30xbf16>,
    return
  }
  func.func @transform_0(%arg0: i32) -> (i32, i32) {
    %c0_i32 = arith.constant 0 : i32
    %c0_i32_0 = arith.constant 0 : i32
    return %arg0, %c0_i32 : i32, i32
  }
  func.func @transform_1(%arg0: i32) -> (i32, i32) {
    %c0_i32 = arith.constant 0 : i32
    %c0_i32_0 = arith.constant 0 : i32
    %c0_i32_1 = arith.constant 0 : i32
    return %c0_i32, %c0_i32_0 : i32, i32
  }
  func.func @transform_2(%arg0: i32) -> (i32, i32) {
    %c0_i32 = arith.constant 0 : i32
    %c0_i32_0 = arith.constant 0 : i32
    %c0_i32_1 = arith.constant 0 : i32
    return %c0_i32, %c0_i32_0 : i32, i32
  }
  func.func @transform_3(%arg0: i32) -> (i32, i32) {
    %c0_i32 = arith.constant 0 : i32
    %c0_i32_0 = arith.constant 0 : i32
    %c0_i32_1 = arith.constant 0 : i32
    return %c0_i32, %c0_i32_0 : i32, i32
  }
  func.func @transform_4(%arg0: i32) -> (i32, i32) {
    %c0_i32 = arith.constant 0 : i32
    %c0_i32_0 = arith.constant 0 : i32
    %c0_i32_1 = arith.constant 0 : i32
    return %c0_i32, %c0_i32_0 : i32, i32
  }
  func.func @transform_5(%arg0: i32) -> (i32, i32) {
    %c0_i32 = arith.constant 0 : i32
    %c0_i32_0 = arith.constant 0 : i32
    return %arg0, %c0_i32 : i32, i32
  }
}

</mosaic_0001>

<bundles_post_ra>
// kernel: net_forward.1
= control target key start
LH: loop header
LB: loop body
LE: loop exit
PB: predicated region body
PF: predicated region fallthrough
CT: control target
= control target key end

     0   :  { %vm50_vm0 = vcmask 1043456   ;;  %v383_v1 = vmov 0   ;;  %vm46_vm1 = vcmask 64512   ;;  %v26_v22 = vlaneseq  ;;  %s480_s1 = inlined_call_operand.vmem [shape: bf16[8,256], index: 1, kind: input, shape index: {}]   ;;  %s481_s0 = inlined_call_operand.vmem [shape: bf16[16,8], index: 0, kind: input, shape index: {}]   ;;  %s482_s3 = inlined_call_operand.vmem [shape: bf16[256,30], index: 3, kind: input, shape index: {}]   ;;  %s483_s2 = inlined_call_operand.vmem [shape: f32[1,256], index: 2, kind: input, shape index: {}]   ;;  %s484_s4 = inlined_call_operand.vmem [shape: f32[1,30], index: 4, kind: input, shape index: {}]   ;;  %s485_s5 = inlined_call_operand.vmem [shape: bf16[16,30], index: 5, kind: output, shape index: {}]  }
   0x1   :  { %v23_v0 = vld [vmem:[%s480_s1] sm:$0xff]  ;;  %89 = vmatprep.mubr.bf16.mxu0 %v383_v1  ;;  %v361_v8 = vld [vmem:[%s482_s3 + $0x48] sm:$0xff]   ;;  %v363_v10 = vld [vmem:[%s482_s3 + $0x50] sm:$0xff]   ;;  %vm300_vm2 = vcmask 240640  }
   0x2   :  { %v309_v2 = vcombine.high %v23_v0, %v23_v0  ;;  %v308_v3 = vcombine.low %v23_v0, %v23_v0  ;;  %v358_v4 = vld [vmem:[%s481_s0] sm:$0xff]   ;;  %v362_v9 = vld [vmem:[%s482_s3 + $0x8] sm:$0xff]   ;;  %v364_v11 = vld [vmem:[%s482_s3 + $0x10] sm:$0xff]   ;;  %v27_v23 = vshrl.u32 %v26_v22, 7 }
   0x3   :  { %v359_v5 = vld [vmem:[%s482_s3 + $0x40] sm:$0xff]   ;;  %v365_v12 = vld [vmem:[%s482_s3 + $0x58] sm:$0xff]   ;;  %v369_v16 = vld [vmem:[%s482_s3 + $0x68] sm:$0xff]  }
   0x4   :  { %310 = vmatprep.subr.msk.bf16.mxu0 %vm50_vm0, %v309_v2  ;;  %v52_v6 = vsel %vm50_vm0, %v308_v3, 0  ;;  %v360_v7 = vld [vmem:[%s482_s3] sm:$0xff]   ;;  %333 = vmatprep.subr.bf16.mxu1 %v359_v5  ;;  %v366_v13 = vld [vmem:[%s482_s3 + $0x18] sm:$0xff]   ;;  %v370_v17 = vld [vmem:[%s482_s3 + $0x28] sm:$0xff]   ;;  %v28_v24 = vsub.s32 0, %v27_v23  ;;  %v32_v26 = vsub.s32 1, %v27_v23 }
   0x5   :  { %58 = vmatpush1.bf16.msra.mxu0 %v52_v6  ;;  %334 = vmatpush3.bf16.msra.mxu1 %v360_v7  ;;  %v367_v14 = vld [vmem:[%s482_s3 + $0x60] sm:$0xff]   ;;  %v371_v18 = vld [vmem:[%s482_s3 + $0x70] sm:$0xff]   ;;  %v373_v20 = vld [vmem:[%s482_s3 + $0x78] sm:$0xff]  }
   0x6   :  { %335 = vmatprep.subr.bf16.mxu1 %v361_v8  ;;  %v368_v15 = vld [vmem:[%s482_s3 + $0x20] sm:$0xff]   ;;  %v372_v19 = vld [vmem:[%s482_s3 + $0x30] sm:$0xff]   ;;  %v374_v21 = vld [vmem:[%s482_s3 + $0x38] sm:$0xff]  }
   0x7   :  { %v24_v25 = vld [vmem:[%s483_s2] sm:$0x3] }
   0x8   :  { %311 = vmatmul.mubr.msk.bf16.vlgmr.msra.gmra.mrb[0].mxu0 %vm46_vm1, %v358_v4  ;;  %v29_v27 = vrot.slane %v24_v25, %v28_v24  ;;  %v33_v28 = vrot.slane %v24_v25, %v32_v26  ;;  %v312_v44 = vld [vmem:[%s484_s4] ss:$0 sm:$0xff] }
   0x9   :  { %336 = vmatpush3.bf16.msra.mxu1 %v362_v9 }
   0xa   :  { %337 = vmatprep.subr.bf16.mxu1 %v363_v10 }
   0xd   :  { %338 = vmatpush3.bf16.msra.mxu1 %v364_v11 }
   0xe   :  { %339 = vmatprep.subr.bf16.mxu1 %v365_v12 }
  0x11   :  { %340 = vmatpush3.bf16.msra.mxu1 %v366_v13 }
  0x12   :  { %341 = vmatprep.subr.bf16.mxu1 %v367_v14 }
  0x15   :  { %342 = vmatpush3.bf16.msra.mxu1 %v368_v15 }
  0x16   :  { %343 = vmatprep.subr.bf16.mxu1 %v369_v16 }
  0x19   :  { %344 = vmatpush3.bf16.msra.mxu1 %v370_v17 }
  0x1a   :  { %345 = vmatprep.subr.bf16.mxu1 %v371_v18 }
  0x1d   :  { %346 = vmatpush3.bf16.msra.mxu1 %v372_v19 }
  0x1e   :  { %347 = vmatprep.subr.bf16.mxu1 %v373_v20 }
  0x21   :  { %348 = vmatpush3.bf16.msra.mxu1 %v374_v21 }
  0xdb   :  { %v91_v29 = vpop.f32.mrb[0].mxu0 }
  0xdc   :  { %v92_v30 = vadd.f32 %v91_v29, %v29_v27  ;;  %v93_v31 = vpop.f32.mrb[1].mxu0 }
  0xdd   :  { %v94_v32 = vadd.f32 %v93_v31, %v33_v28  ;;  %v95_v33 = vpop.f32.mrb[2].mxu0 }
  0xde   :  { %v96_v34 = vadd.f32 %v95_v33, %v29_v27  ;;  %v97_v35 = vpop.f32.mrb[3].mxu0  ;;  %v100_v37 = vmax.f32 %v92_v30, 0.0 }
  0xdf   :  { %v98_v36 = vadd.f32 %v97_v35, %v33_v28  ;;  %v101_v39 = vmax.f32 %v94_v32, 0.0 }
  0xe0   :  { %v102_v38 = vmax.f32 %v96_v34, 0.0 }
  0xe1   :  { %v103_v40 = vmax.f32 %v98_v36, 0.0 }
  0xe2   :  { %v104_v41 = vpack.c.bf16 %v102_v38, %v100_v37 }
  0xe3   :  { %v105_v42 = vpack.c.bf16 %v103_v40, %v101_v39 }
  0xe5   :  { %273 = vmatprep.mubr.bf16.mxu1 %v105_v42 }
  0xe6   :  { %274 = vmatmul.mubr.bf16.vlgmr.msra.gmra.mrb[0].mxu1 %v104_v41 }
 0x1b9   :  { %v349_v43 = vpop.f32.mrb[0].mxu1 }
 0x1ba   :  { %v350_v45 = vpop.f32.mrb[1].mxu1 }
 0x1bb   :  { %v351_v46 = vadd.f32 %v350_v45, %v349_v43  ;;  %v352_v47 = vpop.f32.mrb[2].mxu1 }
 0x1bc   :  { %v353_v48 = vpop.f32.mrb[3].mxu1 }
 0x1bd   :  { %v276_v49 = vadd.f32 %v351_v46, %v312_v44  ;;  %v354_v50 = vadd.f32 %v353_v48, %v352_v47 }
 0x1bf   :  { %v282_v51 = vsub.f32 0.0, %v276_v49  ;;  %v279_v52 = vadd.f32 %v354_v50, %v312_v44 }
 0x1c1   :  { %v284_v53 = vmul.f32 1.442695, %v282_v51  ;;  %v283_v54 = vsub.f32 0.0, %v279_v52 }
 0x1c3   :  { %375 = vpow2.f32 %v284_v53  ;;  %v286_v55 = vmul.f32 1.442695, %v283_v54 }
 0x1c5   :  { %377 = vpow2.f32 %v286_v55 }
 0x1cd   :  { %v376_v56 = vpop.eup %375 }
 0x1ce   :  { %v288_v57 = vadd.f32 1.0, %v376_v56 }
 0x1cf   :  { %v378_v58 = vpop.eup %377 }
 0x1d0   :  { %379 = vrcp.f32 %v288_v57  ;;  %v289_v59 = vadd.f32 1.0, %v378_v58 }
 0x1d2   :  { %381 = vrcp.f32 %v289_v59 }
 0x1da   :  { %v380_v60 = vpop.eup %379 }
 0x1db   :  { %v331_v61 = vpack.c.bf16 %v380_v60, %v380_v60 }
 0x1dc   :  { %v382_v62 = vpop.eup %381 }
 0x1dd   :  { %301 = vst.msk [vmem:[%s485_s5] sm:$0xf] %vm300_vm2, %v331_v61  ;;  %v332_v63 = vpack.c.bf16 %v382_v62, %v382_v62 }
 0x1df   :  { %302 = vst.msk [vmem:[%s485_s5 + $0x4] sm:$0xf] %vm300_vm2, %v332_v63 }

</bundles_post_ra>
